<compile_context>
chip_gen: v5e
topology: v5e:2x2
jax: 0.10.0
libtpu: 0.0.40
codegen_flags: <defaults>
</compile_context>

<pallas_src>
import jax
import jax.numpy as jnp
from jax.experimental import pallas as pl
from jax.experimental.pallas import tpu as pltpu


def _round_up(x, m):
    return ((x + m - 1) // m) * m


def _conv_relu_kernel(x_ref, w_ref, b_ref, o_ref):
    """One grid step = one MXU matmul + fused bias/ReLU epilogue.

    x_ref : (mb, K)        bf16  row-block of the H-shifted/flattened input
    w_ref : (K, Wo*Cout)   bf16  banded weight (kh, kw, cin all folded into K)
    b_ref : (1, Wo*Cout)   f32   bias tiled over the Wo positions
    o_ref : (mb, Wo*Cout)  f32   lane-dense output row-block
    """
    acc = jnp.dot(x_ref[...], w_ref[...], preferred_element_type=jnp.float32)
    o_ref[...] = jnp.maximum(acc + b_ref[...], 0.0).astype(o_ref.dtype)


def make_conv_relu(weight, bias=None, *, width, stride=1, padding=None,
                   compute_dtype=jnp.bfloat16):
    """Build a jitted Conv2d(stride=1, groups=1)+ReLU forward for a fixed image width.

    weight : (Cout, Cin, k, k) float32  (PyTorch conv weight layout)
    bias   : (Cout,) float32 or None
    width  : spatial width W the forward will be called with (the band depends on W)

    The banded weight and tiled bias are precomputed here, once — not re-built on
    every forward call.
    """
    assert stride == 1, "only the stride=1 path (module default) is implemented"
    Cout, Cin, k, k2 = weight.shape
    assert k == k2
    if padding is None:                      # PyTorch module default for stride=1
        padding = (k - 1) // 2
    p = int(padding)
    if bias is None:
        bias = jnp.zeros((Cout,), jnp.float32)

    Wp = width + 2 * p
    Wo = Wp - (k - 1)                        # matches PyTorch conv output width
    WpC = Wp * Cin
    WoC = Wo * Cout
    KW = k * WpC                             # full contraction length (kh, kw, cin)

    # ---- banded ("lowered Toeplitz") weight, built ONCE -----------------------------
    # wband[kh*WpC + w*Cin + c, x*Cout + co] = weight[co, c, kh, w-x]  if 0 <= w-x < k
    w_t = jnp.transpose(weight.astype(jnp.float32), (2, 3, 1, 0))   # (kh, kw, Cin, Cout)
    j = jnp.arange(WpC)                      # j = w*Cin + c
    m = jnp.arange(WoC)                      # m = x*Cout + co
    w_of_j, c_of_j = j // Cin, j % Cin
    x_of_m, co_of_m = m // Cout, m % Cout
    kw = w_of_j[:, None] - x_of_m[None, :]                           # (WpC, WoC)
    valid = (kw >= 0) & (kw < k)
    wband = w_t[:, jnp.clip(kw, 0, k - 1), c_of_j[:, None], co_of_m[None, :]]
    wband = jnp.where(valid[None, :, :], wband, 0.0)                 # (k, WpC, WoC)
    wband = wband.reshape(KW, WoC).astype(compute_dtype)             # bf16 MXU operand

    b_tiled = jnp.tile(bias.astype(jnp.float32), (Wo,)).reshape(1, WoC)

    lhs_bytes = jnp.dtype(compute_dtype).itemsize
    wband_bytes = int(wband.size) * lhs_bytes
    bias_bytes = int(b_tiled.size) * 4

    @jax.jit
    def forward(x):
        """x: (N, Cin, H, W) float32 NCHW -> (N, Cout, H, W) float32."""
        N, Cin_x, H, W = x.shape
        assert Cin_x == Cin and W == width
        Hp = H + 2 * p
        Ho = Hp - (k - 1)

        # ---- layout glue (fuses under jit; vanishes for an NHWC pipeline) ----------
        x_nhwc = jnp.transpose(x, (0, 2, 3, 1))                      # (N, H, W, Cin)
        x_pad = jnp.pad(x_nhwc, ((0, 0), (p, p), (p, p), (0, 0)))    # (N, Hp, Wp, Cin)
        x_pad = x_pad.reshape(N, Hp, WpC)
        # im2row along H only: the k H-shifted views are concatenated along lanes so
        # kh, kw and cin all live in the single matmul K dimension (K = k*Wp*Cin).
        lhs = jnp.concatenate([x_pad[:, kh:kh + Ho, :] for kh in range(k)], axis=-1)
        lhs = lhs.reshape(N * Ho, KW)                                # (N*Ho, K)

        # ---- batch/rows folded into M; pick the row-block size ---------------------
        total_rows = N * Ho
        mb = min(_round_up(total_rows, 8), 256)          # fill the 256-tall MXU
        n_steps = -(-total_rows // mb)
        if n_steps < 2 and total_rows >= 16:
            n_steps = 2                                  # keep both v7x TCs busy
        mb = _round_up(-(-total_rows // n_steps), 8)
        rows_padded = mb * n_steps
        lhs = jnp.pad(lhs, ((0, rows_padded - total_rows), (0, 0)))
        lhs = lhs.astype(compute_dtype)                  # bf16 MXU operand

        flops = 2 * rows_padded * KW * WoC               # MXU FLOPs actually executed
        bytes_accessed = (rows_padded * KW * lhs_bytes + wband_bytes + bias_bytes
                          + rows_padded * WoC * 4)

        out_flat = pl.pallas_call(
            _conv_relu_kernel,
            out_shape=jax.ShapeDtypeStruct((rows_padded, WoC), jnp.float32),
            grid_spec=pltpu.PrefetchScalarGridSpec(
                num_scalar_prefetch=0,
                grid=(n_steps,),
                in_specs=[
                    pl.BlockSpec((mb, KW), lambda i: (i, 0)),
                    pl.BlockSpec((KW, WoC), lambda i: (0, 0)),   # constant -> DMA'd once
                    pl.BlockSpec((1, WoC), lambda i: (0, 0)),    # constant -> DMA'd once
                ],
                out_specs=pl.BlockSpec((mb, WoC), lambda i: (i, 0)),
            ),
            compiler_params=pltpu.CompilerParams(
                dimension_semantics=("parallel",)),      # megacore / 2 TCs on v7x
            cost_estimate=pl.CostEstimate(
                flops=flops, transcendentals=0, bytes_accessed=bytes_accessed),
        )(lhs, wband, b_tiled)

        out = out_flat[:total_rows].reshape(N, Ho, Wo, Cout)
        return jnp.transpose(out, (0, 3, 1, 2))          # back to NCHW

    return forward


if __name__ == "__main__":
    key = jax.random.PRNGKey(0)
    kx, kw_key, kb = jax.random.split(key, 3)

    # Small shapes consistent with the module: Conv_ReLU(4, 8, kernel_size=3)
    N, Cin, H, W = 2, 4, 16, 16
    Cout, ksz = 8, 3

    x = jax.random.normal(kx, (N, Cin, H, W), dtype=jnp.float32)
    fan_in = Cin * ksz * ksz
    weight = jax.random.normal(kw_key, (Cout, Cin, ksz, ksz), dtype=jnp.float32) / jnp.sqrt(fan_in)
    bias = jax.random.normal(kb, (Cout,), dtype=jnp.float32) * 0.1

    conv_relu = make_conv_relu(weight, bias, width=W)    # band + bias built once here
    out = jax.block_until_ready(conv_relu(x))

    # Reference: XLA conv with the same bf16 MXU inputs / f32 accumulation + ReLU.
    p = (ksz - 1) // 2
    ref = jax.lax.conv_general_dilated(
        x.astype(jnp.bfloat16), weight.astype(jnp.bfloat16),
        window_strides=(1, 1), padding=((p, p), (p, p)),
        dimension_numbers=("NCHW", "OIHW", "NCHW"),
        preferred_element_type=jnp.float32)
    ref = jnp.maximum(ref + bias[None, :, None, None], 0.0)

    assert out.shape == (N, Cout, H, W), out.shape
    assert jnp.allclose(out, ref, atol=2e-2, rtol=2e-2), float(jnp.max(jnp.abs(out - ref)))

    print("KERNEL_OK")
</pallas_src>

<mosaic_0001>
module attributes {stable_mosaic.version = 11 : i64} {
  func.func @_conv_relu_kernel(%arg0: i32, %arg1: memref<16x216xbf16, #tpu.memory_space<vmem>>, %arg2: memref<216x128xbf16, #tpu.memory_space<vmem>>, %arg3: memref<1x128xf32, #tpu.memory_space<vmem>>, %arg4: memref<16x128xf32, #tpu.memory_space<vmem>>) attributes {dimension_semantics = [#tpu.dimension_semantics<parallel>], iteration_bounds = array<i64: 2>, scalar_prefetch = 0 : i64, scratch_operands = 0 : i64, tpu.core_type = #tpu.core_type<tc>, window_params = [{transform_indices = @transform_0, window_bounds = array<i64: 16, 216>}, {pipeline_mode = #tpu.pipeline_mode<synchronous>, transform_indices = @transform_1, window_bounds = array<i64: 216, 128>}, {pipeline_mode = #tpu.pipeline_mode<synchronous>, transform_indices = @transform_2, window_bounds = array<i64: 1, 128>}, {transform_indices = @transform_3, window_bounds = array<i64: 16, 128>}]} {
    %c0 = arith.constant 0 : index
    %c0_0 = arith.constant 0 : index
    %0 = vector.load %arg1[%c0, %c0_0] : memref<16x216xbf16, #tpu.memory_space<vmem>>, vector<16x216xbf16>
    %c0_1 = arith.constant 0 : index
    %c0_2 = arith.constant 0 : index
    %1 = vector.load %arg2[%c0_1, %c0_2] : memref<216x128xbf16, #tpu.memory_space<vmem>>, vector<216x128xbf16>
    %cst = arith.constant dense<0.000000e+00> : vector<16x128xf32>
    %2 = tpu.matmul %0, %1, %cst {dimension_numbers = #tpu.dot_dimension_numbers<[1], [0], [0], [1], [0, 0, 1, 1], [], []>} : vector<16x216xbf16>, vector<216x128xbf16>, vector<16x128xf32> -> vector<16x128xf32>
    %c0_3 = arith.constant 0 : index
    %c0_4 = arith.constant 0 : index
    %3 = vector.load %arg3[%c0_3, %c0_4] : memref<1x128xf32, #tpu.memory_space<vmem>>, vector<1x128xf32>
    %4 = vector.broadcast %3 : vector<1x128xf32> to vector<16x128xf32>
    %5 = arith.addf %2, %4 : vector<16x128xf32>
    %cst_5 = arith.constant 0.000000e+00 : f32
    %6 = vector.broadcast %cst_5 : f32 to vector<16x128xf32>
    %7 = arith.maximumf %5, %6 : vector<16x128xf32>
    %c0_6 = arith.constant 0 : index
    %c0_7 = arith.constant 0 : index
    %8 = vector.load %arg4[%c0_6, %c0_7] : memref<16x128xf32, #tpu.memory_space<vmem>>, vector<16x128xf32>
    tpu.vector_store %arg4[%c0_6, %c0_7], %7 {strides = array<i32>} : memref<16x128xf32, #tpu.memory_space<vmem>>, vector<16x128xf32>,
    return
  }
  func.func @transform_0(%arg0: i32) -> (i32, i32) {
    %c0_i32 = arith.constant 0 : i32
    %c0_i32_0 = arith.constant 0 : i32
    return %arg0, %c0_i32 : i32, i32
  }
  func.func @transform_1(%arg0: i32) -> (i32, i32) {
    %c0_i32 = arith.constant 0 : i32
    %c0_i32_0 = arith.constant 0 : i32
    %c0_i32_1 = arith.constant 0 : i32
    return %c0_i32, %c0_i32_0 : i32, i32
  }
  func.func @transform_2(%arg0: i32) -> (i32, i32) {
    %c0_i32 = arith.constant 0 : i32
    %c0_i32_0 = arith.constant 0 : i32
    %c0_i32_1 = arith.constant 0 : i32
    return %c0_i32, %c0_i32_0 : i32, i32
  }
  func.func @transform_3(%arg0: i32) -> (i32, i32) {
    %c0_i32 = arith.constant 0 : i32
    %c0_i32_0 = arith.constant 0 : i32
    return %arg0, %c0_i32 : i32, i32
  }
}

</mosaic_0001>

<bundles_post_ra>
// kernel: forward.1
= control target key start
LH: loop header
LB: loop body
LE: loop exit
PB: predicated region body
PF: predicated region fallthrough
CT: control target
= control target key end

     0   :  { %s523_s12 = smov 0   ;;  %s588_s0 = inlined_call_operand.vmem [shape: bf16[32,216], index: 0, kind: input, shape index: {}]   ;;  %s589_s1 = inlined_call_operand.vmem [shape: bf16[216,128], index: 1, kind: input, shape index: {}]   ;;  %s590_s2 = inlined_call_operand.vmem [shape: f32[1,128], index: 2, kind: input, shape index: {}]   ;;  %s591_s3 = inlined_call_operand.vmem [shape: f32[32,128], index: 3, kind: output, shape index: {}]  }
   0x1 LB: > { %s397_s13 = sadd.s32 4294967295, %s501_s12   ;;  %p401_p0 = scmp.ge.s32.totalorder %s501_s12, 1  ;;  %s501_s12 = sphi %s523_s12, %s13_s12  }
   0x2   : > { %p139_p1 = scmp.lt.s32.totalorder %s501_s12, 3 }
   0x4   : > { %p140_p2 = pnand %p401_p0, %p139_p1 }
   0x5   : > { %s402_s20 = sshll.u32 (!%p140_p2), %s397_s13, 1 }
   0x6   : > { %143 = sbr.rel (%p140_p2) target bundleno = 184 (0xb8), region = 32  ;;  %p165_p3 = scmp.lt.s32.totalorder (!%p140_p2), %s402_s20, 3 }
   0xb   : > { %v480_v0 = vld [vmem:[%s589_s1 + $0x38] sm:$0xff]  ;;  %v206_v1 = vld [vmem:[%s589_s1 + $0x68] sm:$0xf]  ;;  %vm305_vm0 = vcmask 1043456   ;;  %v479_v3 = vld [vmem:[%s589_s1 + $0x30] sm:$0xff]  ;;  %s593_s20 = smov (!%p165_p3, %s402_s20), 3 }
   0xc   : > { %v273_v2 = vunpack.c.l.b16 %v206_v1  ;;  %309 = vmatpush.bf16.msra.mxu0 %v480_v0  ;;  %v485_v6 = vld [vmem:[%s589_s1 + $0x60] sm:$0xff]  ;;  %v478_v7 = vld [vmem:[%s589_s1 + $0x28] sm:$0xff]  ;;  %v484_v8 = vld [vmem:[%s589_s1 + $0x58] sm:$0xff]  ;;  %s470_s6 = sshll.u32 %s593_s20, 3  ;;  %vm301_vm1 = vcmask 719872  }
   0xd   : > { %v477_v9 = vld [vmem:[%s589_s1 + $0x20] sm:$0xff]  ;;  %v483_v10 = vld [vmem:[%s589_s1 + $0x50] sm:$0xff]  ;;  %v476_v11 = vld [vmem:[%s589_s1 + $0x18] sm:$0xff]  ;;  %s169_s14 = scalar_lea.vmem %s588_s0, %s470_s6  ;;  %s175_s25 = scalar_lea.vmem %s591_s3, %s470_s6 }
   0xe   : > { %v287_v4 = vpack.c.b16 %v273_v2, %v273_v2  ;;  %v482_v12 = vld [vmem:[%s589_s1 + $0x48] sm:$0xff]  ;;  %v475_v13 = vld [vmem:[%s589_s1 + $0x10] sm:$0xff]  ;;  %v481_v14 = vld [vmem:[%s589_s1 + $0x40] sm:$0xff] }
   0xf   : > { %v474_v15 = vld [vmem:[%s589_s1 + $0x8] sm:$0xff]  ;;  %v471_v16 = vld [vmem:[%s169_s14 + $0x4] sm:$0xf]  ;;  %v409_v20 = vld [vmem:[%s169_s14] sm:$0xf] }
  0x10   : > { %v307_v5 = vsel %vm305_vm0, %v287_v4, 0  ;;  %310 = vmatpush.bf16.msra.mxu0 %v479_v3  ;;  %v411_v17 = vld [vmem:[%s169_s14 + $0x8] sm:$0xf0]  ;;  %v473_v19 = vld [vmem:[%s589_s1] sm:$0xff]  ;;  %v472_v21 = vld [vmem:[%s169_s14 + $0x4] sm:$0xf0] }
  0x11   : > { %325 = vmatpush.bf16.msra.mxu1 %v307_v5  ;;  %v414_v18 = vor.u32 %v471_v16, %v411_v17  ;;  %v410_v22 = vor.u32 %v472_v21, %v409_v20  ;;  %v494_v23 = vld [vmem:[%s590_s2] ss:$0 sm:$0xff] }
  0x14   : > { %311 = vmatpush.bf16.msra.mxu0 %v478_v7 }
  0x15   : > { %326 = vmatpush.bf16.msra.mxu1 %v485_v6 }
  0x18   : > { %312 = vmatpush.bf16.msra.mxu0 %v477_v9 }
  0x19   : > { %327 = vmatpush.bf16.msra.mxu1 %v484_v8 }
  0x1c   : > { %313 = vmatpush.bf16.msra.mxu0 %v476_v11 }
  0x1d   : > { %328 = vmatpush.bf16.msra.mxu1 %v483_v10 }
  0x20   : > { %314 = vmatpush.bf16.msra.mxu0 %v475_v13 }
  0x21   : > { %329 = vmatpush.bf16.msra.mxu1 %v482_v12 }
  0x24   : > { %315 = vmatpush.bf16.msra.mxu0 %v474_v15 }
  0x25   : > { %330 = vmatpush.bf16.msra.mxu1 %v481_v14 }
  0x28   : > { %467 = vmatmul.msk.bf16.vlgmr.msra.gmra.mxu1 %vm301_vm1, %v414_v18  ;;  %316 = vmatpush.bf16.msra.mxu0 %v473_v19 }
  0x2b   : > { %317 = vmatmul.bf16.vlgmr.msra.gmra.mxu0 %v410_v22 }
  0xa5   : > { %v332_v24 = vpop.f32.mrf.mxu1 }
  0xa8   : > { %v318_v25 = vpop.f32.mrf.mxu0 }
  0xa9   : > { %v319_v26 = vadd.f32 %v494_v23, %v318_v25 }
  0xab   : > { %v333_v27 = vadd.f32 %v332_v24, %v319_v26 }
  0xad   : > { %v337_v28 = vmax.f32 %v333_v27, 0.0  ;;  %v334_v31 = vpop.f32.mrf.mxu1 }
  0xaf   : > { %339 = vst [vmem:[%s175_s25] sm:$0xff] %v337_v28 }
  0xb0   : > { %v320_v29 = vpop.f32.mrf.mxu0 }
  0xb1   : > { %v321_v30 = vadd.f32 %v494_v23, %v320_v29 }
  0xb3   : > { %v335_v32 = vadd.f32 %v334_v31, %v321_v30 }
  0xb5   : > { %v338_v33 = vmax.f32 %v335_v32, 0.0 }
  0xb7   : > { %340 = vst [vmem:[%s175_s25 + $0x8] sm:$0xff] %v338_v33 }
  0xb8 PF: > { %s13_s12 = sadd.s32 1, %s501_s12  }
  0xb9   : > { %p10_p4 = scmp.ge.s32.totalorder %s13_s12, 4  }
  0xbb   :  { %12 = sbr.rel (!%p10_p4) target bundleno = 1 (0x1), region = 62 }

</bundles_post_ra>
